<compile_context>
chip_gen: v6e
topology: v6e:2x2x1
jax: 0.10.0
libtpu: 0.0.40
codegen_flags: <defaults>
</compile_context>

<pallas_src>
import math

import jax
import jax.numpy as jnp
from jax import lax
from jax.experimental import pallas as pl
from jax.experimental.pallas import tpu as pltpu

_TEMPERATURE = 0.07
_NORM_EPS = 1e-12          # torch.nn.functional.normalize default eps


# -----------------------------------------------------------------------------
# Kernel: whole SniCoLoss_cross head fused (mean-pool -> fused linear1/linear2
#         matmul -> normalize -> pos/neg similarities -> CE(label=0) -> mean).
# -----------------------------------------------------------------------------
def _snico_kernel(q_ref, ea_ref, ebf_ref, wcat_ref, bcat_ref, loss_ref):
    B, Lq, C = q_ref.shape
    Le = ea_ref.shape[1]
    BK = ebf_ref.shape[0]
    K = BK // B
    inv_t = 1.0 / _TEMPERATURE

    # torch.mean(., 1): snippet-axis mean pooling (f32, sublane reduce, tiny).
    qm = jnp.sum(q_ref[...], axis=1) * (1.0 / Lq)      # (B, C)
    km = jnp.sum(ea_ref[...], axis=1) * (1.0 / Le)     # (B, C)

    # Stack every row that needs a linear layer; bf16 LHS for the MXU.
    # Order: [neg rows ; k row(s) ; q row(s)] so neg starts sublane-aligned.
    x = jnp.concatenate(
        [ebf_ref[...].astype(jnp.bfloat16),
         km.astype(jnp.bfloat16),
         qm.astype(jnp.bfloat16)], axis=0)             # (BK + 2B, C)

    # Single fused matmul against [w1t | w2t]; f32 accumulate, f32 bias.
    y = jnp.dot(x, wcat_ref[...],
                preferred_element_type=jnp.float32) + bcat_ref[...]   # (BK+2B, 2C)
    left = y[:, :C]        # linear1(row) for every stacked row
    right = y[:, C:]       # linear2(row) for every stacked row

    # F.normalize along channels == per-row L2 normalize (rsqrt -> EUP slot).
    def l2n(v):
        ss = jnp.sum(v * v, axis=-1, keepdims=True)
        return v * lax.rsqrt(jnp.maximum(ss, _NORM_EPS * _NORM_EPS))

    q = l2n(left[BK + B:])            # (B, C)  linear1 of pooled Q
    rn = l2n(right[:BK + B])          # (BK+B, C)
    neg = rn[:BK].reshape(B, K, C)    # (B, K, C)  (slice at row 0: aligned)
    k = rn[BK:]                       # (B, C)

    # l_pos = einsum('nc,nc->n');  l_neg = einsum('nc,nck->nk');  logits /= T
    l_pos = jnp.sum(q * k, axis=-1, keepdims=True) * inv_t            # (B, 1)
    l_neg = jnp.sum(q[:, None, :] * neg, axis=-1) * inv_t             # (B, K)

    # CrossEntropy with label 0 == logsumexp(logits) - logits[:, 0]
    m = jnp.maximum(jnp.max(l_neg, axis=-1, keepdims=True), l_pos)    # (B, 1)
    s = (jnp.exp(l_pos - m)
         + jnp.sum(jnp.exp(l_neg - m), axis=-1, keepdims=True))       # (B, 1)
    per_sample = jnp.log(s) + m - l_pos                               # (B, 1)

    loss_ref[...] = jnp.sum(per_sample, axis=0, keepdims=True) * (1.0 / B)


def snico_loss_pallas(Q, EA, EB, wcat_bf16, bcat):
    """SniCoLoss_cross forward: contrast_pairs {'Q','EA','EB'} -> scalar loss."""
    B, _, C = Q.shape
    K = EB.shape[1]
    eb_flat = EB.reshape(B * K, C)           # wrapper-side glue reshape only

    rows = B * K + 2 * B
    cost = pl.CostEstimate(
        flops=2 * rows * C * (2 * C),
        transcendentals=2 * rows + B * (K + 1),
        bytes_accessed=(Q.size + EA.size + EB.size) * 4
        + wcat_bf16.size * 2 + bcat.size * 4 + 4,
    )

    vmem = pl.BlockSpec(memory_space=pltpu.MemorySpace.VMEM)
    out = pl.pallas_call(
        _snico_kernel,
        out_shape=jax.ShapeDtypeStruct((1, 1), jnp.float32),
        in_specs=[vmem] * 5,
        out_specs=vmem,
        cost_estimate=cost,
    )(Q, EA, eb_flat, wcat_bf16, bcat)
    return out[0, 0]


# -----------------------------------------------------------------------------
# Module wrapper mirroring the PyTorch SniCoLoss_cross.
# -----------------------------------------------------------------------------
class SniCoLossCrossPallas:
    """Pallas port of SniCoLoss_cross (nn.Linear(256,256) x2 + NCE loss)."""

    def __init__(self, key, channels=256):
        C = channels
        k1, k2, k3, k4 = jax.random.split(key, 4)
        lim = 1.0 / math.sqrt(C)
        # nn.Linear default init: U(-1/sqrt(fan_in), 1/sqrt(fan_in)).  Master
        # weights stay f32 (for reference / training); kernel views are built
        # ONCE below.
        self.w1 = jax.random.uniform(k1, (C, C), jnp.float32, -lim, lim)
        self.b1 = jax.random.uniform(k2, (C,), jnp.float32, -lim, lim)
        self.w2 = jax.random.uniform(k3, (C, C), jnp.float32, -lim, lim)
        self.b2 = jax.random.uniform(k4, (C,), jnp.float32, -lim, lim)
        # Kernel layout, precomputed once:
        #   Wcat = [w1.T | w2.T] (C, 2C) in bf16  (halves the dominant DMA)
        #   bcat = [b1   | b2  ] (1, 2C) in f32   (bias stays full precision)
        self.wcat = jnp.concatenate([self.w1.T, self.w2.T], axis=1).astype(jnp.bfloat16)
        self.bcat = jnp.concatenate([self.b1, self.b2]).reshape(1, 2 * C)

    def forward(self, contrast_pairs):
        return snico_loss_pallas(
            contrast_pairs['Q'], contrast_pairs['EA'], contrast_pairs['EB'],
            self.wcat, self.bcat)

    __call__ = forward


# -----------------------------------------------------------------------------
# Pure-JAX reference for verification.  Mirrors the kernel's bf16 rounding of
# the matmul operands (weights + pooled activations) so the comparison is
# tight; vs. the pure-f32 reference the bf16 weights introduce ~1e-3..1e-2
# absolute loss difference, which is the expected quantization effect.
# -----------------------------------------------------------------------------
def _snico_ref(Q, EA, EB, w1, b1, w2, b2, T=_TEMPERATURE):
    def rb16(x):
        return x.astype(jnp.bfloat16).astype(jnp.float32)

    qm = rb16(Q.mean(axis=1))
    km = rb16(EA.mean(axis=1))
    ebf = rb16(EB)
    w1t = rb16(w1.T)
    w2t = rb16(w2.T)

    q = qm @ w1t + b1
    k = km @ w2t + b2
    neg = jnp.einsum('bkc,cd->bkd', ebf, w2t) + b2

    def n(x):
        return x / jnp.maximum(jnp.linalg.norm(x, axis=-1, keepdims=True), _NORM_EPS)

    q, k, neg = n(q), n(k), n(neg)
    l_pos = jnp.sum(q * k, axis=-1, keepdims=True)
    l_neg = jnp.einsum('bc,bkc->bk', q, neg)
    logits = jnp.concatenate([l_pos, l_neg], axis=1) / T
    return jnp.mean(jax.nn.logsumexp(logits, axis=-1) - logits[:, 0])


if __name__ == "__main__":
    key = jax.random.PRNGKey(0)
    kq, ke, kb, kp = jax.random.split(key, 4)

    B, Lq, Le, K, C = 2, 8, 8, 8, 256   # module hard-codes 256 channels

    contrast_pairs = {
        'Q': jax.random.normal(kq, (B, Lq, C), jnp.float32),
        'EA': jax.random.normal(ke, (B, Le, C), jnp.float32),
        'EB': jax.random.normal(kb, (B, K, C), jnp.float32),
    }

    model = SniCoLossCrossPallas(kp)
    loss = model(contrast_pairs)
    jax.block_until_ready(loss)

    loss_ref = _snico_ref(contrast_pairs['Q'], contrast_pairs['EA'],
                          contrast_pairs['EB'],
                          model.w1, model.b1, model.w2, model.b2)
    assert jnp.allclose(loss, loss_ref, atol=1e-3, rtol=1e-3), (loss, loss_ref)

    print("KERNEL_OK")
</pallas_src>

<mosaic_0001>
module attributes {stable_mosaic.version = 11 : i64} {
  func.func @_snico_kernel(%arg0: memref<2x8x256xf32, #tpu.memory_space<vmem>>, %arg1: memref<2x8x256xf32, #tpu.memory_space<vmem>>, %arg2: memref<16x256xf32, #tpu.memory_space<vmem>>, %arg3: memref<256x512xbf16, #tpu.memory_space<vmem>>, %arg4: memref<1x512xf32, #tpu.memory_space<vmem>>, %arg5: memref<1x1xf32, #tpu.memory_space<vmem>>) attributes {dimension_semantics = [], scalar_prefetch = 0 : i64, scratch_operands = 0 : i64, tpu.core_type = #tpu.core_type<tc>} {
    %c0 = arith.constant 0 : index
    %c0_0 = arith.constant 0 : index
    %c0_1 = arith.constant 0 : index
    %0 = vector.load %arg0[%c0, %c0_0, %c0_1] : memref<2x8x256xf32, #tpu.memory_space<vmem>>, vector<2x8x256xf32>
    %cst = arith.constant dense<0.000000e+00> : vector<2x256xf32>
    %1 = vector.multi_reduction <add>, %0, %cst [1] : vector<2x8x256xf32> to vector<2x256xf32>
    %cst_2 = arith.constant 1.250000e-01 : f32
    %2 = vector.broadcast %cst_2 : f32 to vector<2x256xf32>
    %3 = arith.mulf %1, %2 : vector<2x256xf32>
    %c0_3 = arith.constant 0 : index
    %c0_4 = arith.constant 0 : index
    %c0_5 = arith.constant 0 : index
    %4 = vector.load %arg1[%c0_3, %c0_4, %c0_5] : memref<2x8x256xf32, #tpu.memory_space<vmem>>, vector<2x8x256xf32>
    %cst_6 = arith.constant dense<0.000000e+00> : vector<2x256xf32>
    %5 = vector.multi_reduction <add>, %4, %cst_6 [1] : vector<2x8x256xf32> to vector<2x256xf32>
    %cst_7 = arith.constant 1.250000e-01 : f32
    %6 = vector.broadcast %cst_7 : f32 to vector<2x256xf32>
    %7 = arith.mulf %5, %6 : vector<2x256xf32>
    %c0_8 = arith.constant 0 : index
    %c0_9 = arith.constant 0 : index
    %8 = vector.load %arg2[%c0_8, %c0_9] : memref<16x256xf32, #tpu.memory_space<vmem>>, vector<16x256xf32>
    %9 = arith.truncf %8 : vector<16x256xf32> to vector<16x256xbf16>
    %10 = arith.truncf %7 : vector<2x256xf32> to vector<2x256xbf16>
    %11 = arith.truncf %3 : vector<2x256xf32> to vector<2x256xbf16>
    %12 = tpu.concatenate %9, %10, %11 in 0 : vector<16x256xbf16>, vector<2x256xbf16>, vector<2x256xbf16> -> vector<20x256xbf16>
    %c0_10 = arith.constant 0 : index
    %c0_11 = arith.constant 0 : index
    %13 = vector.load %arg3[%c0_10, %c0_11] : memref<256x512xbf16, #tpu.memory_space<vmem>>, vector<256x512xbf16>
    %cst_12 = arith.constant dense<0.000000e+00> : vector<20x512xf32>
    %14 = tpu.matmul %12, %13, %cst_12 {dimension_numbers = #tpu.dot_dimension_numbers<[1], [0], [0], [1], [0, 0, 1, 1], [], []>} : vector<20x256xbf16>, vector<256x512xbf16>, vector<20x512xf32> -> vector<20x512xf32>
    %c0_13 = arith.constant 0 : index
    %c0_14 = arith.constant 0 : index
    %15 = vector.load %arg4[%c0_13, %c0_14] : memref<1x512xf32, #tpu.memory_space<vmem>>, vector<1x512xf32>
    %16 = vector.broadcast %15 : vector<1x512xf32> to vector<20x512xf32>
    %17 = arith.addf %14, %16 : vector<20x512xf32>
    %18 = vector.extract_strided_slice %17 {offsets = [0, 0], sizes = [20, 256], strides = [1, 1]} : vector<20x512xf32> to vector<20x256xf32>
    %19 = vector.extract_strided_slice %17 {offsets = [0, 256], sizes = [20, 256], strides = [1, 1]} : vector<20x512xf32> to vector<20x256xf32>
    %20 = vector.extract_strided_slice %18 {offsets = [18, 0], sizes = [2, 256], strides = [1, 1]} : vector<20x256xf32> to vector<2x256xf32>
    %21 = arith.mulf %20, %20 : vector<2x256xf32>
    %cst_15 = arith.constant dense<0.000000e+00> : vector<2xf32>
    %22 = vector.multi_reduction <add>, %21, %cst_15 [1] : vector<2x256xf32> to vector<2xf32>
    %23 = vector.shape_cast %22 : vector<2xf32> to vector<2x1xf32>
    %cst_16 = arith.constant 1.000000e-24 : f32
    %24 = vector.broadcast %cst_16 : f32 to vector<2x1xf32>
    %25 = arith.maximumf %23, %24 : vector<2x1xf32>
    %26 = math.rsqrt %25 : vector<2x1xf32>
    %27 = vector.broadcast %26 : vector<2x1xf32> to vector<2x256xf32>
    %28 = arith.mulf %20, %27 : vector<2x256xf32>
    %29 = vector.extract_strided_slice %19 {offsets = [0, 0], sizes = [18, 256], strides = [1, 1]} : vector<20x256xf32> to vector<18x256xf32>
    %30 = arith.mulf %29, %29 : vector<18x256xf32>
    %cst_17 = arith.constant dense<0.000000e+00> : vector<18xf32>
    %31 = vector.multi_reduction <add>, %30, %cst_17 [1] : vector<18x256xf32> to vector<18xf32>
    %32 = vector.shape_cast %31 : vector<18xf32> to vector<18x1xf32>
    %cst_18 = arith.constant 1.000000e-24 : f32
    %33 = vector.broadcast %cst_18 : f32 to vector<18x1xf32>
    %34 = arith.maximumf %32, %33 : vector<18x1xf32>
    %35 = math.rsqrt %34 : vector<18x1xf32>
    %36 = vector.broadcast %35 : vector<18x1xf32> to vector<18x256xf32>
    %37 = arith.mulf %29, %36 : vector<18x256xf32>
    %38 = vector.extract_strided_slice %37 {offsets = [0, 0], sizes = [16, 256], strides = [1, 1]} : vector<18x256xf32> to vector<16x256xf32>
    %39 = vector.shape_cast %38 : vector<16x256xf32> to vector<2x8x256xf32>
    %40 = vector.extract_strided_slice %37 {offsets = [16, 0], sizes = [2, 256], strides = [1, 1]} : vector<18x256xf32> to vector<2x256xf32>
    %41 = arith.mulf %28, %40 : vector<2x256xf32>
    %cst_19 = arith.constant dense<0.000000e+00> : vector<2xf32>
    %42 = vector.multi_reduction <add>, %41, %cst_19 [1] : vector<2x256xf32> to vector<2xf32>
    %43 = vector.shape_cast %42 : vector<2xf32> to vector<2x1xf32>
    %cst_20 = arith.constant 14.2857141 : f32
    %44 = vector.broadcast %cst_20 : f32 to vector<2x1xf32>
    %45 = arith.mulf %43, %44 : vector<2x1xf32>
    %46 = vector.shape_cast %28 : vector<2x256xf32> to vector<2x1x256xf32>
    %47 = vector.broadcast %46 : vector<2x1x256xf32> to vector<2x8x256xf32>
    %48 = arith.mulf %47, %39 : vector<2x8x256xf32>
    %cst_21 = arith.constant dense<0.000000e+00> : vector<2x8xf32>
    %49 = vector.multi_reduction <add>, %48, %cst_21 [2] : vector<2x8x256xf32> to vector<2x8xf32>
    %cst_22 = arith.constant 14.2857141 : f32
    %50 = vector.broadcast %cst_22 : f32 to vector<2x8xf32>
    %51 = arith.mulf %49, %50 : vector<2x8xf32>
    %cst_23 = arith.constant dense<0xFF800000> : vector<2xf32>
    %52 = vector.multi_reduction <maximumf>, %51, %cst_23 [1] : vector<2x8xf32> to vector<2xf32>
    %53 = vector.shape_cast %52 : vector<2xf32> to vector<2x1xf32>
    %54 = arith.maximumf %53, %45 : vector<2x1xf32>
    %55 = arith.subf %45, %54 : vector<2x1xf32>
    %56 = math.exp %55 : vector<2x1xf32>
    %57 = vector.broadcast %54 : vector<2x1xf32> to vector<2x8xf32>
    %58 = arith.subf %51, %57 : vector<2x8xf32>
    %59 = math.exp %58 : vector<2x8xf32>
    %cst_24 = arith.constant dense<0.000000e+00> : vector<2xf32>
    %60 = vector.multi_reduction <add>, %59, %cst_24 [1] : vector<2x8xf32> to vector<2xf32>
    %61 = vector.shape_cast %60 : vector<2xf32> to vector<2x1xf32>
    %62 = arith.addf %56, %61 : vector<2x1xf32>
    %63 = math.log %62 : vector<2x1xf32>
    %64 = arith.addf %63, %54 : vector<2x1xf32>
    %65 = arith.subf %64, %45 : vector<2x1xf32>
    %cst_25 = arith.constant dense<0.000000e+00> : vector<1xf32>
    %66 = vector.multi_reduction <add>, %65, %cst_25 [0] : vector<2x1xf32> to vector<1xf32>
    %67 = vector.shape_cast %66 : vector<1xf32> to vector<1x1xf32>
    %cst_26 = arith.constant 5.000000e-01 : f32
    %68 = vector.broadcast %cst_26 : f32 to vector<1x1xf32>
    %69 = arith.mulf %67, %68 : vector<1x1xf32>
    %c0_27 = arith.constant 0 : index
    %c0_28 = arith.constant 0 : index
    %70 = vector.load %arg5[%c0_27, %c0_28] : memref<1x1xf32, #tpu.memory_space<vmem>>, vector<1x1xf32>
    tpu.vector_store %arg5[%c0_27, %c0_28], %69 {strides = array<i32>} : memref<1x1xf32, #tpu.memory_space<vmem>>, vector<1x1xf32>,
    return
  }
}

</mosaic_0001>

<bundles_post_ra>
// kernel: tpu_custom_call.1
= control target key start
LH: loop header
LB: loop body
LE: loop exit
PB: predicated region body
PF: predicated region fallthrough
CT: control target
= control target key end

     0   :  { %10 = vsyncpa [#allocation3], 0  ;;  %s1325_s0 = inlined_call_operand.hbm [shape: f32[2,8,256], index: 0, kind: input, shape index: {}]   ;;  %s1326_s1 = inlined_call_operand.hbm [shape: f32[2,8,256], index: 1, kind: input, shape index: {}]   ;;  %s1327_s2 = inlined_call_operand.hbm [shape: f32[16,256], index: 2, kind: input, shape index: {}]   ;;  %s1328_s3 = inlined_call_operand.hbm [shape: bf16[256,512], index: 3, kind: input, shape index: {}]   ;;  %s1329_s4 = inlined_call_operand.vmem [shape: f32[1,512], index: 4, kind: input, shape index: {}]   ;;  %s1330_s5 = inlined_call_operand.hbm [shape: f32[1,1], index: 5, kind: output, shape index: {}]  }
   0x1   :  { %11 = vsyncpa [#allocation6], 0 }
   0x2   :  { %12 = vsyncpa [#allocation9], 0 }
   0x3   :  { %13 = vsyncpa [#allocation4], 0  ;;  %s1210_s18 = smov [#allocation5]   ;;  %s1211_s20 = smov [#allocation2]  }
   0x4   :  { %s31_s19 = sshll.u32 %s1210_s18, 4  ;;  %s19_s21 = sshll.u32 %s1211_s20, 4  ;;  %s32_s19 = int_to_ptr.vmem [resolvable:$true] %s31_s19  ;;  %s20_s21 = int_to_ptr.vmem [resolvable:$true] %s19_s21 }
   0x5   :  { %s1110_s22 = scalar_lea.vmem %s32_s19, 512  ;;  %p1115_p1 = scmp.lt.s32.totalorder %s32_s19, %s32_s19 }
   0x6   :  { %p1111_p0 = scmp.ne.s32.totalorder %s32_s19, %s1110_s22  ;;  %p1116_p2 = scmp.lt.s32.totalorder %s1110_s22, %s1110_s22 }
   0x8   :  { %p1117_p3 = por %p1116_p2, %p1115_p1 }
   0xa   :  { %p1118_p4 = pnand %p1117_p3, %p1111_p0 }
   0xc   :  { %1121 = shalt.err (!%p1118_p4)
}
   0xd   :  { %s1212_s23 = smov 256   ;;  %s1213_s24 = smov 16  }
   0xe   :  { %37 = dma.hbm_to_vmem [thread:$0]  %s1326_s1, 512, %s32_s19, [#allocation6], %s1212_s23, %s1212_s23, %s1213_s24  }
   0xf   :  { %s1130_s27 = scalar_lea.vmem %s20_s21, 512  ;;  %p1135_p6 = scmp.lt.s32.totalorder %s20_s21, %s20_s21 }
  0x10   :  { %p1131_p5 = scmp.ne.s32.totalorder %s20_s21, %s1130_s27  ;;  %p1136_p7 = scmp.lt.s32.totalorder %s1130_s27, %s1130_s27 }
  0x12   :  { %p1137_p8 = por %p1136_p7, %p1135_p6 }
  0x14   :  { %p1138_p9 = pnand %p1137_p8, %p1131_p5 }
  0x16   :  { %1141 = shalt.err (!%p1138_p9)
}
  0x17   :  { %25 = dma.hbm_to_vmem [thread:$0]  %s1325_s0, 512, %s20_s21, [#allocation3], %s1212_s23, %s1212_s23, %s1213_s24  }
  0x18   :  { %s1214_s30 = smov [#allocation7]   ;;  %s1215_s7 = smov [#allocation8]  }
  0x19   :  { %s43_s6 = sshll.u32 %s1214_s30, 4  ;;  %s55_s8 = sshll.u32 %s1215_s7, 4  ;;  %s44_s6 = int_to_ptr.vmem [resolvable:$true] %s43_s6  ;;  %s56_s8 = int_to_ptr.vmem [resolvable:$true] %s55_s8 }
  0x1a   :  { %s1150_s1 = scalar_lea.vmem %s44_s6, 512  ;;  %p1155_p11 = scmp.lt.s32.totalorder %s44_s6, %s44_s6 }
  0x1b   :  { %p1151_p10 = scmp.ne.s32.totalorder %s44_s6, %s1150_s1  ;;  %p1156_p12 = scmp.lt.s32.totalorder %s1150_s1, %s1150_s1 }
  0x1d   :  { %p1157_p13 = por %p1156_p12, %p1155_p11 }
  0x1f   :  { %p1158_p0 = pnand %p1157_p13, %p1151_p10 }
  0x21   :  { %1161 = shalt.err (!%p1158_p0)
}
  0x22   :  { %49 = dma.hbm_to_vmem [thread:$0]  %s1327_s2, 512, %s44_s6, [#allocation6], %s1212_s23, %s1212_s23, %s1213_s24  }
  0x23   :  { %s1170_s0 = scalar_lea.vmem %s56_s8, 8192  ;;  %p1175_p2 = scmp.lt.s32.totalorder %s56_s8, %s56_s8 }
  0x24   :  { %p1171_p1 = scmp.ne.s32.totalorder %s56_s8, %s1170_s0  ;;  %p1176_p3 = scmp.lt.s32.totalorder %s1170_s0, %s1170_s0 }
  0x26   :  { %p1177_p4 = por %p1176_p3, %p1175_p2 }
  0x28   :  { %p1178_p5 = pnand %p1177_p4, %p1171_p1 }
  0x2a   :  { %1181 = shalt.err (!%p1178_p5)
}
  0x2b   :  { %61 = dma.hbm_to_vmem [thread:$0]  %s1328_s3, 8192, %s56_s8, [#allocation9], %s1212_s23, %s1212_s23, %s1213_s24  }
  0x2c   :  { %1202 = dma.done.wait [#allocation3], 512  }
  0x2d   :  { %1203 = vsyncadd [#allocation3], 4294966784 }
  0x2e   :  { %1204 = dma.done.wait [#allocation6], 1024  }
  0x2f   :  { %1205 = vsyncadd [#allocation6], 4294966272 }
  0x30   :  { %1206 = dma.done.wait [#allocation9], 8192  }
  0x31   :  { %1207 = vsyncadd [#allocation9], 4294959104  ;;  %v990_v0 = vld [vmem:[#allocation8 + $0xe4] ss:$16 sps:$4 sm:$0xff]   ;;  %v992_v1 = vld [vmem:[#allocation8 + $0xec] ss:$16 sps:$4 sm:$0xff]  }
  0x32   :  { %595 = vmatprep.subr.bf16.mxu0 %v990_v0  ;;  %v994_v2 = vld [vmem:[#allocation8 + $0xe0] ss:$16 sps:$4 sm:$0xff]   ;;  %v995_v3 = vld [vmem:[#allocation8 + $0xe8] ss:$16 sps:$4 sm:$0xff]   ;;  %642 = vmatprep.subr.bf16.mxu1 %v992_v1  ;;  %v996_v4 = vld [vmem:[#allocation8 + $0xc4] ss:$16 sps:$4 sm:$0xff]  }
  0x33   :  { %596 = vmatpush1.bf16.msra.mxu0 %v994_v2  ;;  %643 = vmatpush1.bf16.msra.mxu1 %v995_v3  ;;  %v998_v5 = vld [vmem:[#allocation8 + $0xcc] ss:$16 sps:$4 sm:$0xff]   ;;  %v1000_v6 = vld [vmem:[#allocation8 + $0xc0] ss:$16 sps:$4 sm:$0xff]   ;;  %v1001_v7 = vld [vmem:[#allocation8 + $0xc8] ss:$16 sps:$4 sm:$0xff]  }
  0x34   :  { %597 = vmatprep.subr.bf16.mxu0 %v996_v4  ;;  %644 = vmatprep.subr.bf16.mxu1 %v998_v5  ;;  %v1002_v8 = vld [vmem:[#allocation8 + $0xa4] ss:$16 sps:$4 sm:$0xff]   ;;  %v1004_v9 = vld [vmem:[#allocation8 + $0xac] ss:$16 sps:$4 sm:$0xff]   ;;  %v1006_v10 = vld [vmem:[#allocation8 + $0xa0] ss:$16 sps:$4 sm:$0xff]  }
  0x35   :  { %v1007_v11 = vld [vmem:[#allocation8 + $0xa8] ss:$16 sps:$4 sm:$0xff]   ;;  %v1008_v12 = vld [vmem:[#allocation8 + $0x84] ss:$16 sps:$4 sm:$0xff]   ;;  %v1010_v13 = vld [vmem:[#allocation8 + $0x8c] ss:$16 sps:$4 sm:$0xff]  }
  0x36   :  { %v1012_v14 = vld [vmem:[#allocation8 + $0x80] ss:$16 sps:$4 sm:$0xff]   ;;  %v1013_v15 = vld [vmem:[#allocation8 + $0x88] ss:$16 sps:$4 sm:$0xff]   ;;  %v1014_v16 = vld [vmem:[#allocation8 + $0x64] ss:$16 sps:$4 sm:$0xff]  }
  0x37   :  { %598 = vmatpush1.bf16.msra.mxu0 %v1000_v6  ;;  %645 = vmatpush1.bf16.msra.mxu1 %v1001_v7  ;;  %v1016_v17 = vld [vmem:[#allocation8 + $0x6c] ss:$16 sps:$4 sm:$0xff]   ;;  %v1018_v18 = vld [vmem:[#allocation8 + $0x60] ss:$16 sps:$4 sm:$0xff]   ;;  %v1019_v19 = vld [vmem:[#allocation8 + $0x68] ss:$16 sps:$4 sm:$0xff]  }
  0x38   :  { %599 = vmatprep.subr.bf16.mxu0 %v1002_v8  ;;  %646 = vmatprep.subr.bf16.mxu1 %v1004_v9  ;;  %v1020_v20 = vld [vmem:[#allocation8 + $0x44] ss:$16 sps:$4 sm:$0xff]   ;;  %v1022_v21 = vld [vmem:[#allocation8 + $0x4c] ss:$16 sps:$4 sm:$0xff]   ;;  %v1024_v22 = vld [vmem:[#allocation8 + $0x40] ss:$16 sps:$4 sm:$0xff]  }
  0x39   :  { %v1025_v23 = vld [vmem:[#allocation8 + $0x48] ss:$16 sps:$4 sm:$0xff]   ;;  %v1026_v24 = vld [vmem:[#allocation8 + $0x24] ss:$16 sps:$4 sm:$0xff]   ;;  %v1028_v25 = vld [vmem:[#allocation8 + $0x2c] ss:$16 sps:$4 sm:$0xff]  }
  0x3a   :  { %v1030_v26 = vld [vmem:[#allocation8 + $0x20] ss:$16 sps:$4 sm:$0xff]   ;;  %v1031_v27 = vld [vmem:[#allocation8 + $0x28] ss:$16 sps:$4 sm:$0xff]   ;;  %v1032_v28 = vld [vmem:[#allocation8 + $0x4] ss:$16 sps:$4 sm:$0xff]  }
  0x3b   :  { %600 = vmatpush1.bf16.msra.mxu0 %v1006_v10  ;;  %647 = vmatpush1.bf16.msra.mxu1 %v1007_v11  ;;  %v1034_v29 = vld [vmem:[#allocation8 + $0xc] ss:$16 sps:$4 sm:$0xff]   ;;  %v1036_v30 = vld [vmem:[#allocation8] ss:$16 sps:$4 sm:$0xff]   ;;  %v1037_v31 = vld [vmem:[#allocation8 + $0x8] ss:$16 sps:$4 sm:$0xff]  }
  0x3c   :  { %601 = vmatprep.subr.bf16.mxu0 %v1008_v12  ;;  %648 = vmatprep.subr.bf16.mxu1 %v1010_v13  ;;  %v1038_v32 = vld [vmem:[#allocation8 + $0x1e4] ss:$16 sps:$4 sm:$0xff]   ;;  %v1040_v33 = vld [vmem:[#allocation8 + $0x1ec] ss:$16 sps:$4 sm:$0xff]   ;;  %v1042_v34 = vld [vmem:[#allocation8 + $0x1e0] ss:$16 sps:$4 sm:$0xff]  }
  0x3d   :  { %v1043_v35 = vld [vmem:[#allocation8 + $0x1e8] ss:$16 sps:$4 sm:$0xff]   ;;  %v1044_v36 = vld [vmem:[#allocation8 + $0x1c4] ss:$16 sps:$4 sm:$0xff]   ;;  %v1046_v37 = vld [vmem:[#allocation8 + $0x1cc] ss:$16 sps:$4 sm:$0xff]  }
  0x3e   :  { %v1048_v38 = vld [vmem:[#allocation8 + $0x1c0] ss:$16 sps:$4 sm:$0xff]   ;;  %v1049_v39 = vld [vmem:[#allocation8 + $0x1c8] ss:$16 sps:$4 sm:$0xff]   ;;  %v1050_v40 = vld [vmem:[#allocation8 + $0x1a4] ss:$16 sps:$4 sm:$0xff]  }
  0x3f   :  { %602 = vmatpush1.bf16.msra.mxu0 %v1012_v14  ;;  %649 = vmatpush1.bf16.msra.mxu1 %v1013_v15  ;;  %v1052_v41 = vld [vmem:[#allocation8 + $0x1ac] ss:$16 sps:$4 sm:$0xff]   ;;  %v1054_v42 = vld [vmem:[#allocation8 + $0x1a0] ss:$16 sps:$4 sm:$0xff]   ;;  %v1055_v43 = vld [vmem:[#allocation8 + $0x1a8] ss:$16 sps:$4 sm:$0xff]  }
  0x40   :  { %603 = vmatprep.subr.bf16.mxu0 %v1014_v16  ;;  %650 = vmatprep.subr.bf16.mxu1 %v1016_v17  ;;  %v1056_v44 = vld [vmem:[#allocation8 + $0x184] ss:$16 sps:$4 sm:$0xff]   ;;  %v1058_v45 = vld [vmem:[#allocation8 + $0x18c] ss:$16 sps:$4 sm:$0xff]   ;;  %v1060_v46 = vld [vmem:[#allocation8 + $0x180] ss:$16 sps:$4 sm:$0xff]  }
  0x41   :  { %v1061_v47 = vld [vmem:[#allocation8 + $0x188] ss:$16 sps:$4 sm:$0xff]   ;;  %v1062_v49 = vld [vmem:[#allocation8 + $0x164] ss:$16 sps:$4 sm:$0xff]   ;;  %v1064_v50 = vld [vmem:[#allocation8 + $0x16c] ss:$16 sps:$4 sm:$0xff]  }
  0x42   :  { %v141_v48 = vld [vmem:[#allocation7 + $0x8] sm:$0xff]  ;;  %v143_v51 = vld [vmem:[#allocation7 + $0x18] sm:$0xff]  ;;  %v76_v60 = vld [vmem:[#allocation2] sm:$0xff]  ;;  %vm175_vm0 = vcmask 1043459   ;;  %vm162_vm1 = vcmask 1041409   ;;  %vm180_vm2 = vcmask 1040384  }
  0x43   :  { %604 = vmatpush1.bf16.msra.mxu0 %v1018_v18  ;;  %651 = vmatpush1.bf16.msra.mxu1 %v1019_v19  ;;  %v145_v52 = vpack.c.bf16 %v143_v51, %v141_v48  ;;  %v77_v53 = vld [vmem:[#allocation2 + $0x8] sm:$0xff]  ;;  %v79_v54 = vld [vmem:[#allocation2 + $0x18] sm:$0xff]  ;;  %v78_v61 = vld [vmem:[#allocation2 + $0x10] sm:$0xff]  ;;  %v80_v63 = vrot.slane %v76_v60, 4  ;;  %vm717_vm3 = vcmask 1041408   ;;  %vm695_vm4 = vcmask 1043458  }
  0x44   :  { %605 = vmatprep.subr.bf16.mxu0 %v1020_v20  ;;  %652 = vmatprep.subr.bf16.mxu1 %v1022_v21  ;;  %v109_v55 = vld [vmem:[#allocation5 + $0x8] sm:$0xff]  ;;  %v86_v56 = vrot.slane %v77_v53, 4  ;;  %v98_v57 = vrot.slane %v79_v54, 4  ;;  %v111_v58 = vld [vmem:[#allocation5 + $0x18] sm:$0xff]  ;;  %v92_v0 = vrot.slane %v78_v61, 4  ;;  %v108_v1 = vld [vmem:[#allocation5] sm:$0xff] }
  0x45   :  { %v118_v59 = vrot.slane %v109_v55, 4  ;;  %627 = vmatprep.mubr.bf16.mxu0 %v145_v52  ;;  %674 = vmatprep.mubr.bf16.mxu1 %v145_v52  ;;  %v130_v62 = vrot.slane %v111_v58, 4  ;;  %v110_v2 = vld [vmem:[#allocation5 + $0x10] sm:$0xff]  ;;  %v112_v7 = vrot.slane %v108_v1, 4  ;;  %v1067_v8 = vld [vmem:[#allocation8 + $0x168] ss:$16 sps:$4 sm:$0xff]   ;;  %v81_v11 = vadd.f32 %v80_v63, %v76_v60 }
  0x46   :  { %v1066_v3 = vld [vmem:[#allocation8 + $0x160] ss:$16 sps:$4 sm:$0xff]   ;;  %v87_v4 = vadd.f32 %v86_v56, %v77_v53  ;;  %v99_v5 = vadd.f32 %v98_v57, %v79_v54  ;;  %v1068_v9 = vld [vmem:[#allocation8 + $0x144] ss:$16 sps:$4 sm:$0xff]   ;;  %v93_v12 = vadd.f32 %v92_v0, %v78_v61  ;;  %v124_v13 = vrot.slane %v110_v2, 4 }
  0x47   :  { %606 = vmatpush1.bf16.msra.mxu0 %v1024_v22  ;;  %653 = vmatpush1.bf16.msra.mxu1 %v1025_v23  ;;  %v119_v6 = vadd.f32 %v118_v59, %v109_v55  ;;  %v131_v10 = vadd.f32 %v130_v62, %v111_v58  ;;  %v1070_v14 = vld [vmem:[#allocation8 + $0x14c] ss:$16 sps:$4 sm:$0xff]   ;;  %v113_v18 = vadd.f32 %v112_v7, %v108_v1  ;;  %v82_v20 = vrot.slane %v81_v11, 2  ;;  %v1072_v23 = vld [vmem:[#allocation8 + $0x140] ss:$16 sps:$4 sm:$0xff]  }
  0x48   :  { %607 = vmatprep.subr.bf16.mxu0 %v1026_v24  ;;  %654 = vmatprep.subr.bf16.mxu1 %v1028_v25  ;;  %v88_v15 = vrot.slane %v87_v4, 2  ;;  %v100_v16 = vrot.slane %v99_v5, 2  ;;  %v94_v21 = vrot.slane %v93_v12, 2  ;;  %v125_v22 = vadd.f32 %v124_v13, %v110_v2  ;;  %v1079_v48 = vld [vmem:[#allocation8 + $0x128] ss:$16 sps:$4 sm:$0xff]  }
  0x49   :  { %v120_v17 = vrot.slane %v119_v6, 2  ;;  %v132_v19 = vrot.slane %v131_v10, 2  ;;  %v1082_v54 = vld [vmem:[#allocation8 + $0x10c] ss:$16 sps:$4 sm:$0xff]   ;;  %v1084_v63 = vld [vmem:[#allocation8 + $0x100] ss:$16 sps:$4 sm:$0xff]  }
  0x4a   :  { %v89_v24 = vadd.f32 %v88_v15, %v87_v4  ;;  %v101_v25 = vadd.f32 %v100_v16, %v99_v5  ;;  %v1085_v4 = vld [vmem:[#allocation8 + $0x108] ss:$16 sps:$4 sm:$0xff]   ;;  %v140_v5 = vld [vmem:[#allocation7] sm:$0xff]  ;;  %vm822_vm5 = vcmask 58368   ;;  %vm887_vm6 = vcmask 1024  }
  0x4b   :  { %608 = vmatpush1.bf16.msra.mxu0 %v1030_v26  ;;  %655 = vmatpush1.bf16.msra.mxu1 %v1031_v27  ;;  %v121_v26 = vadd.f32 %v120_v17, %v119_v6  ;;  %v114_v27 = vrot.slane %v113_v18, 2  ;;  %v142_v6 = vld [vmem:[#allocation7 + $0x10] sm:$0xff]  ;;  %vm896_vm7 = vcmask 0  }
  0x4c   :  { %609 = vmatprep.subr.bf16.mxu0 %v1032_v28  ;;  %656 = vmatprep.subr.bf16.mxu1 %v1034_v29  ;;  %v1073_v28 = vld [vmem:[#allocation8 + $0x148] ss:$16 sps:$4 sm:$0xff]   ;;  %v1074_v29 = vld [vmem:[#allocation8 + $0x124] ss:$16 sps:$4 sm:$0xff]  }
  0x4f   :  { %610 = vmatpush1.bf16.msra.mxu0 %v1036_v30  ;;  %657 = vmatpush1.bf16.msra.mxu1 %v1037_v31  ;;  %v133_v30 = vadd.f32 %v132_v19, %v131_v10  ;;  %v83_v31 = vadd.f32 %v82_v20, %v81_v11  ;;  %v144_v19 = vpack.c.bf16 %v142_v6, %v140_v5 }
  0x50   :  { %611 = vmatprep.subr.bf16.mxu0 %v1038_v32  ;;  %658 = vmatprep.subr.bf16.mxu1 %v1040_v33  ;;  %v95_v32 = vadd.f32 %v94_v21, %v93_v12  ;;  %v126_v33 = vrot.slane %v125_v22, 2 }
  0x53   :  { %612 = vmatpush2.bf16.msra.mxu0 %v1042_v34  ;;  %659 = vmatpush2.bf16.msra.mxu1 %v1043_v35  ;;  %v1076_v34 = vld [vmem:[#allocation8 + $0x12c] ss:$16 sps:$4 sm:$0xff]   ;;  %v90_v35 = vrot.slane %v89_v24, 1 }
  0x54   :  { %613 = vmatprep.subr.bf16.mxu0 %v1044_v36  ;;  %660 = vmatprep.subr.bf16.mxu1 %v1046_v37  ;;  %v102_v36 = vrot.slane %v101_v25, 1  ;;  %v122_v37 = vrot.slane %v121_v26, 1 }
  0x57   :  { %614 = vmatpush2.bf16.msra.mxu0 %v1048_v38  ;;  %661 = vmatpush2.bf16.msra.mxu1 %v1049_v39  ;;  %v115_v38 = vadd.f32 %v114_v27, %v113_v18  ;;  %v134_v39 = vrot.slane %v133_v30, 1 }
  0x58   :  { %615 = vmatprep.subr.bf16.mxu0 %v1050_v40  ;;  %662 = vmatprep.subr.bf16.mxu1 %v1052_v41  ;;  %v84_v40 = vrot.slane %v83_v31, 1  ;;  %v96_v41 = vrot.slane %v95_v32, 1 }
  0x5a   :  { %v85_v51 = vadd.f32 %v84_v40, %v83_v31  ;;  %v97_v52 = vadd.f32 %v96_v41, %v95_v32  ;;  %v255_v32 = vlaneseq }
  0x5b   :  { %616 = vmatpush2.bf16.msra.mxu0 %v1054_v42  ;;  %663 = vmatpush2.bf16.msra.mxu1 %v1055_v43  ;;  %v127_v42 = vadd.f32 %v126_v33, %v125_v22  ;;  %v1078_v43 = vld [vmem:[#allocation8 + $0x120] ss:$16 sps:$4 sm:$0xff]  }
  0x5c   :  { %617 = vmatprep.subr.bf16.mxu0 %v1056_v44  ;;  %664 = vmatprep.subr.bf16.mxu1 %v1058_v45  ;;  %v91_v44 = vadd.f32 %v90_v35, %v89_v24  ;;  %v103_v45 = vadd.f32 %v102_v36, %v101_v25  ;;  %v104_v60 = vmul.f32 0.125, %v85_v51  ;;  %v106_v61 = vmul.f32 0.125, %v97_v52  ;;  %v253_v35 = vld [vmem:[%s1329_s4] sm:$0xf]  ;;  %s1218_s4 = smov [#allocation10]  }
  0x5d   :  { %v128_v53 = vrot.slane %v127_v42, 1  ;;  %v1278_v33 = vshrl.u32 %v255_v32, 7  ;;  %s904_s13 = sshll.u32 %s1218_s4, 4  ;;  %s905_s13 = int_to_ptr.vmem [resolvable:$true] %s904_s13 }
  0x5e   :  { %v105_v55 = vmul.f32 0.125, %v91_v44  ;;  %v107_v56 = vmul.f32 0.125, %v103_v45  ;;  %v152_v10 = vpack.c.bf16 %v106_v61, %v106_v61  ;;  %s1182_s14 = scalar_lea.vmem %s905_s13, 16  ;;  %s1186_s15 = scalar_lea.vmem %s905_s13, 32 }
  0x5f   :  { %618 = vmatpush2.bf16.msra.mxu0 %v1060_v46  ;;  %665 = vmatpush2.bf16.msra.mxu1 %v1061_v47  ;;  %v123_v46 = vadd.f32 %v122_v37, %v121_v26  ;;  %v116_v47 = vrot.slane %v115_v38, 1  ;;  %v129_v62 = vadd.f32 %v128_v53, %v127_v42  ;;  %v269_v36 = vsub.s32 3, %v1278_v33  ;;  %p1183_p6 = scmp.ne.s32.totalorder %s905_s13, %s1182_s14  ;;  %p1187_p7 = scmp.lt.s32.totalorder %s905_s13, %s905_s13 }
  0x60   :  { %619 = vmatprep.subr.bf16.mxu0 %v1062_v49  ;;  %666 = vmatprep.subr.bf16.mxu1 %v1064_v50  ;;  %v1080_v49 = vld [vmem:[#allocation8 + $0x104] ss:$16 sps:$4 sm:$0xff]   ;;  %v135_v50 = vadd.f32 %v134_v39, %v133_v30  ;;  %v151_v1 = vpack.c.bf16 %v105_v55, %v105_v55  ;;  %v153_v2 = vpack.c.bf16 %v107_v56, %v107_v56  ;;  %v173_v18 = vunpack.c.l.b16 %v152_v10  ;;  %p1188_p8 = scmp.lt.s32.totalorder %s1186_s15, %s1182_s14 }
  0x61   :  { %v137_v57 = vmul.f32 0.125, %v123_v46  ;;  %v117_v58 = vadd.f32 %v116_v47, %v115_v38  ;;  %v1286_v40 = vsub.s32 0, %v1278_v33  ;;  %v1289_v44 = vsub.s32 1, %v1278_v33 }
  0x62   :  { %v139_v59 = vmul.f32 0.125, %v135_v50  ;;  %v172_v12 = vunpack.c.l.b16 %v151_v1  ;;  %v174_v13 = vunpack.c.l.b16 %v153_v2  ;;  %p1189_p9 = por %p1188_p8, %p1187_p7 }
  0x63   :  { %620 = vmatpush2.bf16.msra.mxu0 %v1066_v3  ;;  %667 = vmatpush2.bf16.msra.mxu1 %v1067_v8  ;;  %v147_v0 = vpack.c.bf16 %v137_v57, %v137_v57  ;;  %v136_v3 = vmul.f32 0.125, %v117_v58  ;;  %v138_v8 = vmul.f32 0.125, %v129_v62  ;;  %v262_v52 = vrot.slane %v253_v35, %v1289_v44 }
  0x64   :  { %621 = vmatprep.subr.bf16.mxu0 %v1068_v9  ;;  %668 = vmatprep.subr.bf16.mxu1 %v1070_v14  ;;  %v149_v7 = vpack.c.bf16 %v139_v59, %v139_v59  ;;  %v150_v9 = vpack.c.bf16 %v104_v60, %v104_v60  ;;  %v177_v20 = vsel %vm175_vm0, %v174_v13, %v172_v12  ;;  %p1190_p10 = pnand %p1189_p9, %p1183_p6 }
  0x65   :  { %v159_v11 = vunpack.c.l.b16 %v147_v0  ;;  %v146_v14 = vpack.c.bf16 %v136_v3, %v136_v3  ;;  %v148_v16 = vpack.c.bf16 %v138_v8, %v138_v8 }
  0x66   :  { %v161_v15 = vunpack.c.l.b16 %v149_v7  ;;  %v171_v17 = vunpack.c.l.b16 %v150_v9 }
  0x67   :  { %622 = vmatpush2.bf16.msra.mxu0 %v1072_v23  ;;  %669 = vmatpush2.bf16.msra.mxu1 %v1073_v28  ;;  %v158_v21 = vunpack.c.l.b16 %v146_v14  ;;  %v179_v23 = vpack.c.b16 %v177_v20, %v177_v20  ;;  %v160_v24 = vunpack.c.l.b16 %v148_v16 }
  0x68   :  { %623 = vmatprep.subr.bf16.mxu0 %v1074_v29  ;;  %670 = vmatprep.subr.bf16.mxu1 %v1076_v34  ;;  %v164_v22 = vsel %vm162_vm1, %v161_v15, %v159_v11  ;;  %v176_v26 = vsel %vm175_vm0, %v173_v18, %v171_v17  ;;  %v265_v34 = vsub.s32 2, %v1278_v33 }
  0x69   :  { %v166_v25 = vpack.c.b16 %v164_v22, %v164_v22  ;;  %v163_v27 = vsel %vm162_vm1, %v160_v24, %v158_v21  ;;  %v178_v30 = vpack.c.b16 %v176_v26, %v176_v26 }
  0x6a   :  { %v165_v29 = vpack.c.b16 %v163_v27, %v163_v27  ;;  %v266_v39 = vrot.slane %v253_v35, %v265_v34  ;;  %v1216_v27 = vmov 1966171168  }
  0x6b   :  { %624 = vmatpush2.bf16.msra.mxu0 %v1078_v43  ;;  %671 = vmatpush2.bf16.msra.mxu1 %v1079_v48  ;;  %v187_v28 = vsel %vm180_vm2, %v166_v25, %v179_v23  ;;  %v270_v43 = vrot.slane %v253_v35, %v269_v36  ;;  %v258_v48 = vrot.slane %v253_v35, %v1286_v40 }
  0x6c   :  { %625 = vmatprep.subr.bf16.mxu0 %v1080_v49  ;;  %672 = vmatprep.subr.bf16.mxu1 %v1082_v54  ;;  %v183_v31 = vsel %vm180_vm2, %v165_v29, %v178_v30 }
  0x6f   :  { %626 = vmatpush2.bf16.msra.mxu0 %v1084_v63  ;;  %673 = vmatpush2.bf16.msra.mxu1 %v1085_v4 }
  0x72   :  { %628 = vmatmul.mubr.bf16.vlgmr.msra.gmra.mxu0 %v144_v19  ;;  %675 = vmatmul.mubr.bf16.vlgmr.msra.gmra.mxu1 %v144_v19 }
  0x73   :  { %633 = vmatprep.mubr.bf16.mxu0 %v187_v28  ;;  %684 = vmatprep.mubr.bf16.mxu1 %v187_v28  ;;  %v753_v28 = vunpack.c.l.s4 %v1216_v27 }
  0x75   :  { %v754_v29 = vunpack.c.0.s8 %v753_v28 }
  0x77   :  { %v757_v36 = vsub.s32 %v754_v29, %v1278_v33 }
  0x7a   :  { %634 = vmatmul.mubr.bf16.gmra.mxu0 %v183_v31  ;;  %685 = vmatmul.mubr.bf16.gmra.mxu1 %v183_v31 }
 0x132   :  { %v629_v37 = vpop.f32.mrf.mxu0  ;;  %v676_v38 = vpop.f32.mrf.mxu1 }
 0x133   :  { %v677_v59 = vadd.f32 %v676_v38, %v266_v39 }
 0x134   :  { %v630_v41 = vpop.f32.mrf.mxu0  ;;  %v678_v42 = vpop.f32.mrf.mxu1 }
 0x135   :  { %v679_v60 = vadd.f32 %v678_v42, %v270_v43  ;;  %v705_v9 = vmul.f32 %v677_v59, %v677_v59 }
 0x136   :  { %v631_v45 = vpop.f32.mrf.mxu0  ;;  %v680_v46 = vpop.f32.mrf.mxu1 }
 0x137   :  { %v1291_v47 = vadd.f32 %v680_v46, %v266_v39  ;;  %v706_v10 = vmul.f32 %v679_v60, %v679_v60 }
 0x138   :  { %v632_v49 = vpop.f32.mrf.mxu0  ;;  %v682_v50 = vpop.f32.mrf.mxu1 }
 0x139   :  { %v1294_v51 = vadd.f32 %v682_v50, %v270_v43  ;;  %v707_v55 = vmul.f32 %v1291_v47, %v1291_v47  ;;  %v711_v18 = vadd.f32 %v706_v10, %v705_v9 }
 0x13a   :  { %v635_v53 = vpop.f32.mrf.mxu0  ;;  %v686_v54 = vpop.f32.mrf.mxu1 }
 0x13b   :  { %v636_v56 = vadd.f32 %v635_v53, %v258_v48  ;;  %v687_v57 = vadd.f32 %v686_v54, %v266_v39  ;;  %v708_v58 = vmul.f32 %v1294_v51, %v1294_v51 }
 0x13c   :  { %v637_v61 = vpop.f32.mrf.mxu0  ;;  %v688_v62 = vpop.f32.mrf.mxu1 }
 0x13d   :  { %v693_v63 = vmul.f32 %v636_v56, %v636_v56  ;;  %v709_v0 = vmul.f32 %v687_v57, %v687_v57  ;;  %v638_v1 = vadd.f32 %v637_v61, %v262_v52  ;;  %v689_v2 = vadd.f32 %v688_v62, %v270_v43 }
 0x13e   :  { %v639_v3 = vpop.f32.mrf.mxu0  ;;  %v714_v4 = vadd.f32 %v708_v58, %v707_v55  ;;  %v690_v5 = vpop.f32.mrf.mxu1 }
 0x13f   :  { %v694_v6 = vmul.f32 %v638_v1, %v638_v1  ;;  %v710_v7 = vmul.f32 %v689_v2, %v689_v2  ;;  %v718_v8 = vsel %vm717_vm3, %v709_v0, 0.0  ;;  %v696_v14 = vsel %vm695_vm4, %v693_v63, 0.0 }
 0x140   :  { %715 = vadd.xlane.f32.xlu1 %v714_v4  ;;  %v640_v11 = vpop.f32.mrf.mxu0  ;;  %v691_v12 = vpop.f32.mrf.mxu1 }
 0x141   :  { %v719_v13 = vsel %vm717_vm3, %v710_v7, 0.0  ;;  %v697_v15 = vsel %vm695_vm4, %v694_v6, 0.0 }
 0x142   :  { %v720_v16 = vadd.f32 %v719_v13, %v718_v8  ;;  %v698_v17 = vadd.f32 %v697_v15, %v696_v14 }
 0x144   :  { %721 = vadd.xlane.f32.xlu1 %v720_v16  ;;  %699 = vadd.xlane.f32.xlu0 %v698_v17  ;;  %v1217_v17 = vmov 0  }
 0x145   :  { %988 = vset.pattern.permute.xlu0 %v1217_v17  ;;  %989 = vset.pattern.permute.xlu1 %v1217_v17 }
 0x148   :  { %712 = vadd.xlane.f32.xlu0 %v711_v18 }
 0x1c9   :  { %v716_v19 = vpop.xlane.xlu1 %715 }
 0x1ca   :  { %v724_v26 = vmax.f32 %v716_v19, 1e-24 }
 0x1cd   :  { %v722_v20 = vpop.xlane.xlu1 %721  ;;  %v700_v21 = vpop.xlane.xlu0 %699 }
 0x1ce   :  { %v725_v22 = vmax.f32 %v722_v20, 1e-24  ;;  %v701_v23 = vmax.f32 %v700_v21, 1e-24 }
 0x1d0   :  { %1086 = vrsqrt.f32 %v701_v23 }
 0x1d1   :  { %v713_v24 = vpop.xlane.xlu0 %712  ;;  %1088 = vrsqrt.f32 %v725_v22 }
 0x1d2   :  { %v723_v25 = vmax.f32 %v713_v24, 1e-24 }
 0x1d4   :  { %1090 = vrsqrt.f32 %v723_v25 }
 0x1d5   :  { %1092 = vrsqrt.f32 %v724_v26 }
 0x1dd   :  { %v1087_v30 = vpop.eup %1086 }
 0x1de   :  { %v1089_v31 = vpop.eup %1088  ;;  %v703_v34 = vmul.f32 %v1087_v30, %v636_v56  ;;  %v704_v35 = vmul.f32 %v1087_v30, %v638_v1 }
 0x1df   :  { %v733_v38 = vmul.f32 %v1089_v31, %v687_v57  ;;  %v734_v39 = vmul.f32 %v1089_v31, %v689_v2 }
 0x1e0   :  { %v751_v37 = vcombine.low %v703_v34, %v704_v35 }
 0x1e1   :  { %v1091_v42 = vpop.eup %1090  ;;  %v737_v46 = vrot.slane %v733_v38, 6  ;;  %v738_v48 = vrot.slane %v734_v39, 6 }
 0x1e2   :  { %v758_v41 = vrot.slane %v751_v37, %v757_v36  ;;  %v1093_v49 = vpop.eup %1092  ;;  %v729_v53 = vmul.f32 %v1091_v42, %v677_v59  ;;  %v730_v54 = vmul.f32 %v1091_v42, %v679_v60 }
 0x1e3   :  { %v731_v61 = vmul.f32 %v1093_v49, %v1291_v47  ;;  %v732_v57 = vmul.f32 %v1093_v49, %v1294_v51  ;;  %v741_v62 = vmul.f32 %v737_v46, %v703_v34  ;;  %v742_v63 = vmul.f32 %v738_v48, %v704_v35 }
 0x1e4   :  { %v766_v43 = vrot.slane %v758_v41, %v757_v36  ;;  %v759_v45 = vcombine.high %v758_v41, %v758_v41  ;;  %v811_v51 = vand.u32 127, %v255_v32 }
 0x1e5   :  { %v743_v5 = vsel %vm695_vm4, %v741_v62, 0.0  ;;  %v744_v6 = vsel %vm695_vm4, %v742_v63, 0.0 }
 0x1e6   :  { %v774_v50 = vcombine.high %v766_v43, %v766_v43  ;;  %v773_v52 = vrot.slane %v759_v45, %v757_v36  ;;  %v745_v47 = vadd.f32 %v744_v6, %v743_v5  ;;  %v814_v9 = vsub.s32 %v811_v51, %v1278_v33 }
 0x1e8   :  { %v779_v55 = vrot.slane %v774_v50, %v1286_v40  ;;  %v783_v56 = vrot.slane %v774_v50, %v1289_v44  ;;  %v775_v58 = vcombine.high %v773_v52, %v773_v52 }
 0x1ea   :  { %v796_v0 = vmul.f32 %v779_v55, %v729_v53  ;;  %v797_v1 = vmul.f32 %v783_v56, %v730_v54  ;;  %v787_v2 = vrot.slane %v775_v58, %v1286_v40  ;;  %v791_v3 = vrot.slane %v775_v58, %v1289_v44 }
 0x1ec   :  { %v800_v4 = vadd.f32 %v797_v1, %v796_v0  ;;  %v798_v59 = vmul.f32 %v787_v2, %v731_v61  ;;  %v799_v60 = vmul.f32 %v791_v3, %v732_v57 }
 0x1ee   :  { %801 = vadd.xlane.f32.xlu0 %v800_v4  ;;  %v803_v7 = vadd.f32 %v799_v60, %v798_v59 }
 0x1f0   :  { %804 = vadd.xlane.f32.xlu1 %v803_v7 }
 0x1f2   :  { %746 = vadd.xlane.f32.xlu0 %v745_v47 }
 0x277   :  { %v802_v8 = vpop.xlane.xlu0 %801 }
 0x278   :  { %v806_v10 = vmul.f32 14.285714, %v802_v8 }
 0x279   :  { %v805_v11 = vpop.xlane.xlu1 %804 }
 0x27a   :  { %v807_v12 = vmul.f32 14.285714, %v805_v11  ;;  %v815_v13 = vrot.slane %v806_v10, %v814_v9 }
 0x27b   :  { %v747_v18 = vpop.xlane.xlu0 %746 }
 0x27c   :  { %v819_v14 = vrot.slane %v807_v12, %v814_v9  ;;  %v748_v19 = vmul.f32 14.285714, %v747_v18 }
 0x27e   :  { %v820_v15 = vsel %vm162_vm1, %v819_v14, %v815_v13  ;;  %v827_v32 = vrot.slane %v748_v19, 2 }
 0x27f   :  { %v823_v16 = vsel %vm822_vm5, %v820_v15, -inf }
 0x280   :  { %824 = vmax.xlane.f32.xlu1 %v823_v16 }
 0x309   :  { %v825_v20 = vpop.xlane.xlu1 %824 }
 0x30a   :  { %v829_v21 = vmax.f32 %v825_v20, %v827_v32 }
 0x30c   :  { %837 = vperm.xlu0 %988, %v829_v21  }
 0x387   :  { %v838_v33 = vpop.permute.xlu0 %837 }
 0x388   :  { %v842_v22 = vrot.slane %v838_v33, %v1286_v40  ;;  %v846_v23 = vrot.slane %v838_v33, %v1289_v44  ;;  %v831_v44 = vrot.slane %v829_v21, 6 }
 0x38a   :  { %v849_v24 = vsub.f32 %v806_v10, %v842_v22  ;;  %v850_v25 = vsub.f32 %v807_v12, %v846_v23  ;;  %v833_v37 = vsub.f32 %v748_v19, %v831_v44 }
 0x38c   :  { %v851_v26 = vmul.f32 1.442695, %v849_v24  ;;  %v853_v27 = vmul.f32 1.442695, %v850_v25  ;;  %v834_v38 = vmul.f32 1.442695, %v833_v37 }
 0x38e   :  { %1094 = vpow2.f32 %v851_v26 }
 0x38f   :  { %1096 = vpow2.f32 %v853_v27 }
 0x390   :  { %1098 = vpow2.f32 %v834_v38 }
 0x39b   :  { %v1095_v28 = vpop.eup %1094 }
 0x39c   :  { %858 = vperm.xlu1 %989, %v1095_v28   ;;  %v1097_v29 = vpop.eup %1096 }
 0x39d   :  { %v1099_v42 = vpop.eup %1098 }
 0x3a0   :  { %861 = vperm.xlu1 %989, %v1097_v29  }
 0x417   :  { %v859_v30 = vpop.permute.xlu1 %858 }
 0x418   :  { %v866_v34 = vrot.slane %v859_v30, %v814_v9 }
 0x41b   :  { %v862_v31 = vpop.permute.xlu1 %861 }
 0x41c   :  { %v870_v35 = vrot.slane %v862_v31, %v814_v9 }
 0x41e   :  { %v871_v36 = vsel %vm162_vm1, %v870_v35, %v866_v34 }
 0x41f   :  { %v873_v40 = vsel %vm822_vm5, %v871_v36, 0.0 }
 0x420   :  { %874 = vadd.xlane.f32.xlu1 %v873_v40 }
 0x4a9   :  { %v875_v39 = vpop.xlane.xlu1 %874 }
 0x4aa   :  { %v877_v41 = vrot.slane %v875_v39, 6 }
 0x4ac   :  { %v879_v43 = vadd.f32 %v1099_v42, %v877_v41 }
 0x4ae   :  { %1100 = vlog2.f32 %v879_v43 }
 0x4bb   :  { %v1101_v45 = vpop.eup %1100 }
 0x4bc   :  { %v881_v46 = vmul.f32 0.6931472, %v1101_v45 }
 0x4be   :  { %v882_v48 = vadd.f32 %v881_v46, %v831_v44 }
 0x4c0   :  { %v883_v49 = vsub.f32 %v882_v48, %v748_v19 }
 0x4c2   :  { %v885_v50 = vrot.slane %v883_v49, 2 }
 0x4c4   :  { %v888_v52 = vsel %vm887_vm6, %v885_v50, 0.0 }
 0x4c5   :  { %v889_v53 = vrot.slane %v888_v52, 4 }
 0x4c7   :  { %v890_v54 = vadd.f32 %v889_v53, %v888_v52 }
 0x4c9   :  { %v891_v55 = vrot.slane %v890_v54, 2 }
 0x4cb   :  { %v892_v56 = vadd.f32 %v891_v55, %v890_v54 }
 0x4cd   :  { %v893_v58 = vrot.slane %v892_v56, 1 }
 0x4cf   :  { %v894_v61 = vadd.f32 %v893_v58, %v892_v56 }
 0x4d1   :  { %v895_v57 = vmul.f32 0.5, %v894_v61 }
 0x4d3   :  { %897 = vst.msk [vmem:[#allocation10] sm:$0x1] %vm896_vm7, %v895_v57 }
 0x4d4   :  { %1193 = shalt.err (!%p1190_p10)
}
 0x4d5   :  { %907 = dma.vmem_to_hbm [thread:$0]  %s905_s13, 16, %s1330_s5, [#allocation4]  }
 0x4d6   :  { %1208 = dma.done.wait [#allocation4], 16  }
 0x4d7   :  { %1209 = vsyncadd [#allocation4], 4294967280 }
 0x4d8   :  { %911 = vsyncpa [#allocation3], 1 }
 0x4d9   :  { %912 = vsyncpa [#allocation6], 1 }
 0x4da   :  { %913 = vsyncpa [#allocation9], 1 }
 0x4db   :  { %914 = vsyncpa [#allocation4], 1 }

</bundles_post_ra>
